<compile_context>
chip_gen: v5e
topology: v5e:2x2
jax: 0.10.0
libtpu: 0.0.40
codegen_flags: <defaults>
</compile_context>

<pallas_src>
import functools

import jax
import jax.numpy as jnp
import numpy as np
from jax.experimental import pallas as pl
from jax.experimental.pallas import tpu as pltpu


def mcsa_kernel(x_ref, m_ref, wW_ref, bW_ref, wH_ref, bH_ref, wF_ref, bF_ref,
                wP_ref, bP_ref, out_ref, *, W, C, e_lambda):
    """One grid step = `btile` images, laid out as (btile*C, H*W).

    rows  -> (image-in-block, channel) flattened (sublane axis)
    lanes -> flattened H*W spatial positions (lane axis, lane-dense)
    """
    Rb, HW = x_ref.shape
    btile = Rb // C
    n = float(HW - 1)
    inv_hw = 1.0 / float(HW)

    x = x_ref[...]                                   # (Rb, HW) f32
    m = m_ref[...]                                   # (4, HW)  f32 {0,1} masks
    m_wm, m_wp = m[0:1, :], m[1:2, :]                # valid to read w-1 / w+1
    m_hm, m_hp = m[2:3, :], m[3:4, :]                # valid to read h-1 / h+1

    def shifted(v, off, mask):
        # y[r, i] = v[r, i + off] within each row, zero padded ('same' halo).
        return mask * pltpu.roll(v, shift=(-off) % HW, axis=1)

    # ---- dw_w: depthwise (1,3) conv along W (cross-correlation) ------------
    t = (wW_ref[0] * shifted(x, -1, m_wm)
         + wW_ref[1] * x
         + wW_ref[2] * shifted(x, +1, m_wp)
         + bW_ref[...])

    # ---- dw_h: depthwise (3,1) conv along H --------------------------------
    t = (wH_ref[0] * shifted(t, -W, m_hm)
         + wH_ref[1] * t
         + wH_ref[2] * shifted(t, +W, m_hp)
         + bH_ref[...])

    # ---- dw_f: depthwise (3,3) conv -----------------------------------------
    rows = (shifted(t, -W, m_hm), t, shifted(t, +W, m_hp))
    acc = None
    for kh in range(3):
        r = rows[kh]
        term = (wF_ref[3 * kh + 0] * shifted(r, -1, m_wm)
                + wF_ref[3 * kh + 1] * r
                + wF_ref[3 * kh + 2] * shifted(r, +1, m_wp))
        acc = term if acc is None else acc + term
    u = x + acc + bF_ref[...]                        # AxialDW2 residual

    # ---- SimAM-style attention from the ORIGINAL x (one stats pass) ---------
    sum_x = jnp.sum(x, axis=1, keepdims=True)        # (Rb, 1)
    sum_x2 = jnp.sum(x * x, axis=1, keepdims=True)   # (Rb, 1)
    mu = sum_x * inv_hw
    s = sum_x2 - float(HW) * mu * mu                 # = sum((x - mu)^2)
    inv_den = pl.reciprocal(4.0 * (s * (1.0 / n) + e_lambda), approx=True)
    d = x - mu
    y = d * d * inv_den + 0.5
    sig = 0.5 * jnp.tanh(0.5 * y) + 0.5              # sigmoid via EUP tanh

    # ---- pw1: pointwise 1x1 channel mix on the MXU ---------------------------
    wP = wP_ref[...]                                 # (C, C)
    bP = bP_ref[...]                                 # (C, 1)
    parts = []
    for b in range(btile):
        u_b = u[b * C:(b + 1) * C, :]                # (C, HW)
        parts.append(jnp.dot(wP, u_b, preferred_element_type=jnp.float32) + bP)
    pw = parts[0] if btile == 1 else jnp.concatenate(parts, axis=0)

    out_ref[...] = (pw * sig).astype(out_ref.dtype)


def _pick_batch_tile(B, C, HW, bytes_target=2 << 20):
    """Largest batch tile whose (btile*C) row count is sublane-legal and whose
    block stays around the byte target (amortize ~600-cycle per-step cost)."""
    best = None
    for bt in range(1, B + 1):
        if B % bt:
            continue
        rows = bt * C
        if rows % 8 != 0 and rows != B * C:
            continue
        if bt * C * HW * 4 > bytes_target and best is not None:
            break
        best = bt
    return best if best is not None else B


def mcsa_forward(x, params, e_lambda=1e-4):
    B, C, H, W = x.shape
    HW = H * W
    x = x.astype(jnp.float32)

    btile = _pick_batch_tile(B, C, HW)
    Rb = btile * C

    # Per-row weight layout (row r of a block uses channel r % C) so every conv
    # stage is a single broadcasted multiply over the whole (Rb, HW) block.
    def taps(w, k):   # (C, ..., k taps) -> (k, Rb, 1)
        return jnp.tile(jnp.asarray(w, jnp.float32).reshape(C, k).T,
                        (1, btile)).reshape(k, Rb, 1)

    def rowb(b):      # (C,) -> (Rb, 1)
        return jnp.tile(jnp.asarray(b, jnp.float32).reshape(C),
                        (btile,)).reshape(Rb, 1)

    wW, bW = taps(params["dw_w_w"], 3), rowb(params["dw_w_b"])
    wH, bH = taps(params["dw_h_w"], 3), rowb(params["dw_h_b"])
    wF, bF = taps(params["dw_f_w"], 9), rowb(params["dw_f_b"])
    wP = jnp.asarray(params["pw_w"], jnp.float32).reshape(C, C)
    bP = jnp.asarray(params["pw_b"], jnp.float32).reshape(C, 1)

    # 'same'-padding boundary masks for the flattened H*W lane layout,
    # built once on the host and hoisted out of the kernel entirely.
    lane = np.arange(HW)
    col = lane % W
    masks = jnp.asarray(np.stack([col > 0,          # reading w-1 valid
                                  col < W - 1,      # reading w+1 valid
                                  lane >= W,        # reading h-1 valid
                                  lane < HW - W],   # reading h+1 valid
                                 ).astype(np.float32))        # (4, HW)

    x2 = x.reshape(B * C, HW)                       # lane-dense view

    def const(nd):
        return lambda i: (0,) * nd

    out = pl.pallas_call(
        functools.partial(mcsa_kernel, W=W, C=C, e_lambda=float(e_lambda)),
        out_shape=jax.ShapeDtypeStruct((B * C, HW), jnp.float32),
        grid_spec=pltpu.PrefetchScalarGridSpec(
            num_scalar_prefetch=0,
            grid=(B // btile,),
            in_specs=[
                pl.BlockSpec((Rb, HW), lambda i: (i, 0)),    # x
                pl.BlockSpec((4, HW), const(2)),             # boundary masks
                pl.BlockSpec((3, Rb, 1), const(3)),          # dw_w weights
                pl.BlockSpec((Rb, 1), const(2)),             # dw_w bias
                pl.BlockSpec((3, Rb, 1), const(3)),          # dw_h weights
                pl.BlockSpec((Rb, 1), const(2)),             # dw_h bias
                pl.BlockSpec((9, Rb, 1), const(3)),          # dw_f weights
                pl.BlockSpec((Rb, 1), const(2)),             # dw_f bias
                pl.BlockSpec((C, C), const(2)),              # pw weights (MXU)
                pl.BlockSpec((C, 1), const(2)),              # pw bias
            ],
            out_specs=pl.BlockSpec((Rb, HW), lambda i: (i, 0)),
        ),
        compiler_params=pltpu.CompilerParams(
            dimension_semantics=("parallel",),
            vmem_limit_bytes=32 * 1024 * 1024,
        ),
    )(x2, masks, wW, bW, wH, bH, wF, bF, wP, bP)
    return out.reshape(B, C, H, W)


# ---------------- pure-JAX reference (correctness check only) ----------------
def _conv_ref(x, w, b, groups):
    out = jax.lax.conv_general_dilated(
        x, w, window_strides=(1, 1), padding="SAME",
        dimension_numbers=("NCHW", "OIHW", "NCHW"),
        feature_group_count=groups)
    return out + b[None, :, None, None]


def mcsa_ref(x, params, e_lambda=1e-4):
    B, C, H, W = x.shape
    t = _conv_ref(x, params["dw_w_w"], params["dw_w_b"], C)
    t = _conv_ref(t, params["dw_h_w"], params["dw_h_b"], C)
    t = _conv_ref(t, params["dw_f_w"], params["dw_f_b"], C)
    u = x + t
    x1 = _conv_ref(u, params["pw_w"], params["pw_b"], 1)
    n = H * W - 1
    mu = x.mean(axis=(2, 3), keepdims=True)
    d = (x - mu) ** 2
    y = d / (4.0 * (d.sum(axis=(2, 3), keepdims=True) / n + e_lambda)) + 0.5
    return x1 * jax.nn.sigmoid(y)


if __name__ == "__main__":
    B, C, H, W = 2, 4, 16, 16
    key = jax.random.PRNGKey(0)
    ks = jax.random.split(key, 9)
    params = {
        "dw_w_w": 0.3 * jax.random.normal(ks[0], (C, 1, 1, 3), jnp.float32),
        "dw_w_b": 0.1 * jax.random.normal(ks[1], (C,), jnp.float32),
        "dw_h_w": 0.3 * jax.random.normal(ks[2], (C, 1, 3, 1), jnp.float32),
        "dw_h_b": 0.1 * jax.random.normal(ks[3], (C,), jnp.float32),
        "dw_f_w": 0.3 * jax.random.normal(ks[4], (C, 1, 3, 3), jnp.float32),
        "dw_f_b": 0.1 * jax.random.normal(ks[5], (C,), jnp.float32),
        "pw_w":   0.3 * jax.random.normal(ks[6], (C, C, 1, 1), jnp.float32),
        "pw_b":   0.1 * jax.random.normal(ks[7], (C,), jnp.float32),
    }
    x = jax.random.normal(ks[8], (B, C, H, W), jnp.float32)

    out = mcsa_forward(x, params)
    out = jax.block_until_ready(out)

    ref = mcsa_ref(x, params)
    # Slightly loose tolerance: the SimAM denominator uses the EUP approximate
    # reciprocal (pl.reciprocal(approx=True)); logic errors would be >>1e-2.
    np.testing.assert_allclose(np.asarray(out), np.asarray(ref), rtol=1e-2, atol=1e-2)
    print("KERNEL_OK")
</pallas_src>

<mosaic_0001>
module attributes {stable_mosaic.version = 11 : i64} {
  func.func @mcsa_kernel(%arg0: i32, %arg1: memref<8x256xf32, #tpu.memory_space<vmem>>, %arg2: memref<4x256xf32, #tpu.memory_space<vmem>>, %arg3: memref<3x8x1xf32, #tpu.memory_space<vmem>>, %arg4: memref<8x1xf32, #tpu.memory_space<vmem>>, %arg5: memref<3x8x1xf32, #tpu.memory_space<vmem>>, %arg6: memref<8x1xf32, #tpu.memory_space<vmem>>, %arg7: memref<9x8x1xf32, #tpu.memory_space<vmem>>, %arg8: memref<8x1xf32, #tpu.memory_space<vmem>>, %arg9: memref<4x4xf32, #tpu.memory_space<vmem>>, %arg10: memref<4x1xf32, #tpu.memory_space<vmem>>, %arg11: memref<8x256xf32, #tpu.memory_space<vmem>>) attributes {dimension_semantics = [#tpu.dimension_semantics<parallel>], iteration_bounds = array<i64: 1>, scalar_prefetch = 0 : i64, scratch_operands = 0 : i64, tpu.core_type = #tpu.core_type<tc>, window_params = [{transform_indices = @transform_0, window_bounds = array<i64: 8, 256>}, {pipeline_mode = #tpu.pipeline_mode<synchronous>, transform_indices = @transform_1, window_bounds = array<i64: 4, 256>}, {pipeline_mode = #tpu.pipeline_mode<synchronous>, transform_indices = @transform_2, window_bounds = array<i64: 3, 8, 1>}, {pipeline_mode = #tpu.pipeline_mode<synchronous>, transform_indices = @transform_3, window_bounds = array<i64: 8, 1>}, {pipeline_mode = #tpu.pipeline_mode<synchronous>, transform_indices = @transform_4, window_bounds = array<i64: 3, 8, 1>}, {pipeline_mode = #tpu.pipeline_mode<synchronous>, transform_indices = @transform_5, window_bounds = array<i64: 8, 1>}, {pipeline_mode = #tpu.pipeline_mode<synchronous>, transform_indices = @transform_6, window_bounds = array<i64: 9, 8, 1>}, {pipeline_mode = #tpu.pipeline_mode<synchronous>, transform_indices = @transform_7, window_bounds = array<i64: 8, 1>}, {pipeline_mode = #tpu.pipeline_mode<synchronous>, transform_indices = @transform_8, window_bounds = array<i64: 4, 4>}, {pipeline_mode = #tpu.pipeline_mode<synchronous>, transform_indices = @transform_9, window_bounds = array<i64: 4, 1>}, {transform_indices = @transform_10, window_bounds = array<i64: 8, 256>}]} {
    %c0 = arith.constant 0 : index
    %c0_0 = arith.constant 0 : index
    %0 = vector.load %arg1[%c0, %c0_0] : memref<8x256xf32, #tpu.memory_space<vmem>>, vector<8x256xf32>
    %c0_1 = arith.constant 0 : index
    %c0_2 = arith.constant 0 : index
    %1 = vector.load %arg2[%c0_1, %c0_2] : memref<4x256xf32, #tpu.memory_space<vmem>>, vector<4x256xf32>
    %2 = vector.extract_strided_slice %1 {offsets = [0, 0], sizes = [1, 256], strides = [1, 1]} : vector<4x256xf32> to vector<1x256xf32>
    %3 = vector.extract_strided_slice %1 {offsets = [1, 0], sizes = [1, 256], strides = [1, 1]} : vector<4x256xf32> to vector<1x256xf32>
    %4 = vector.extract_strided_slice %1 {offsets = [2, 0], sizes = [1, 256], strides = [1, 1]} : vector<4x256xf32> to vector<1x256xf32>
    %5 = vector.extract_strided_slice %1 {offsets = [3, 0], sizes = [1, 256], strides = [1, 1]} : vector<4x256xf32> to vector<1x256xf32>
    %c0_3 = arith.constant 0 : index
    %c0_4 = arith.constant 0 : index
    %c0_5 = arith.constant 0 : index
    %6 = vector.load %arg3[%c0_3, %c0_4, %c0_5] : memref<3x8x1xf32, #tpu.memory_space<vmem>>, vector<1x8x1xf32>
    %7 = vector.shape_cast %6 : vector<1x8x1xf32> to vector<8x1xf32>
    %c1_i32 = arith.constant 1 : i32
    %8 = tpu.dynamic_rotate %0 by %c1_i32 dim 1 : vector<8x256xf32>, i32 -> vector<8x256xf32>
    %9 = vector.broadcast %2 : vector<1x256xf32> to vector<8x256xf32>
    %10 = arith.mulf %9, %8 : vector<8x256xf32>
    %11 = vector.broadcast %7 : vector<8x1xf32> to vector<8x256xf32>
    %12 = arith.mulf %11, %10 : vector<8x256xf32>
    %c1 = arith.constant 1 : index
    %c0_6 = arith.constant 0 : index
    %c0_7 = arith.constant 0 : index
    %13 = vector.load %arg3[%c1, %c0_6, %c0_7] : memref<3x8x1xf32, #tpu.memory_space<vmem>>, vector<1x8x1xf32>
    %14 = vector.shape_cast %13 : vector<1x8x1xf32> to vector<8x1xf32>
    %15 = vector.broadcast %14 : vector<8x1xf32> to vector<8x256xf32>
    %16 = arith.mulf %15, %0 : vector<8x256xf32>
    %17 = arith.addf %12, %16 : vector<8x256xf32>
    %c2 = arith.constant 2 : index
    %c0_8 = arith.constant 0 : index
    %c0_9 = arith.constant 0 : index
    %18 = vector.load %arg3[%c2, %c0_8, %c0_9] : memref<3x8x1xf32, #tpu.memory_space<vmem>>, vector<1x8x1xf32>
    %19 = vector.shape_cast %18 : vector<1x8x1xf32> to vector<8x1xf32>
    %c255_i32 = arith.constant 255 : i32
    %20 = tpu.dynamic_rotate %0 by %c255_i32 dim 1 : vector<8x256xf32>, i32 -> vector<8x256xf32>
    %21 = vector.broadcast %3 : vector<1x256xf32> to vector<8x256xf32>
    %22 = arith.mulf %21, %20 : vector<8x256xf32>
    %23 = vector.broadcast %19 : vector<8x1xf32> to vector<8x256xf32>
    %24 = arith.mulf %23, %22 : vector<8x256xf32>
    %25 = arith.addf %17, %24 : vector<8x256xf32>
    %c0_10 = arith.constant 0 : index
    %c0_11 = arith.constant 0 : index
    %26 = vector.load %arg4[%c0_10, %c0_11] : memref<8x1xf32, #tpu.memory_space<vmem>>, vector<8x1xf32>
    %27 = vector.broadcast %26 : vector<8x1xf32> to vector<8x256xf32>
    %28 = arith.addf %25, %27 : vector<8x256xf32>
    %c0_12 = arith.constant 0 : index
    %c0_13 = arith.constant 0 : index
    %c0_14 = arith.constant 0 : index
    %29 = vector.load %arg5[%c0_12, %c0_13, %c0_14] : memref<3x8x1xf32, #tpu.memory_space<vmem>>, vector<1x8x1xf32>
    %30 = vector.shape_cast %29 : vector<1x8x1xf32> to vector<8x1xf32>
    %c16_i32 = arith.constant 16 : i32
    %31 = tpu.dynamic_rotate %28 by %c16_i32 dim 1 : vector<8x256xf32>, i32 -> vector<8x256xf32>
    %32 = vector.broadcast %4 : vector<1x256xf32> to vector<8x256xf32>
    %33 = arith.mulf %32, %31 : vector<8x256xf32>
    %34 = vector.broadcast %30 : vector<8x1xf32> to vector<8x256xf32>
    %35 = arith.mulf %34, %33 : vector<8x256xf32>
    %c1_15 = arith.constant 1 : index
    %c0_16 = arith.constant 0 : index
    %c0_17 = arith.constant 0 : index
    %36 = vector.load %arg5[%c1_15, %c0_16, %c0_17] : memref<3x8x1xf32, #tpu.memory_space<vmem>>, vector<1x8x1xf32>
    %37 = vector.shape_cast %36 : vector<1x8x1xf32> to vector<8x1xf32>
    %38 = vector.broadcast %37 : vector<8x1xf32> to vector<8x256xf32>
    %39 = arith.mulf %38, %28 : vector<8x256xf32>
    %40 = arith.addf %35, %39 : vector<8x256xf32>
    %c2_18 = arith.constant 2 : index
    %c0_19 = arith.constant 0 : index
    %c0_20 = arith.constant 0 : index
    %41 = vector.load %arg5[%c2_18, %c0_19, %c0_20] : memref<3x8x1xf32, #tpu.memory_space<vmem>>, vector<1x8x1xf32>
    %42 = vector.shape_cast %41 : vector<1x8x1xf32> to vector<8x1xf32>
    %c240_i32 = arith.constant 240 : i32
    %43 = tpu.dynamic_rotate %28 by %c240_i32 dim 1 : vector<8x256xf32>, i32 -> vector<8x256xf32>
    %44 = vector.broadcast %5 : vector<1x256xf32> to vector<8x256xf32>
    %45 = arith.mulf %44, %43 : vector<8x256xf32>
    %46 = vector.broadcast %42 : vector<8x1xf32> to vector<8x256xf32>
    %47 = arith.mulf %46, %45 : vector<8x256xf32>
    %48 = arith.addf %40, %47 : vector<8x256xf32>
    %c0_21 = arith.constant 0 : index
    %c0_22 = arith.constant 0 : index
    %49 = vector.load %arg6[%c0_21, %c0_22] : memref<8x1xf32, #tpu.memory_space<vmem>>, vector<8x1xf32>
    %50 = vector.broadcast %49 : vector<8x1xf32> to vector<8x256xf32>
    %51 = arith.addf %48, %50 : vector<8x256xf32>
    %c16_i32_23 = arith.constant 16 : i32
    %52 = tpu.dynamic_rotate %51 by %c16_i32_23 dim 1 : vector<8x256xf32>, i32 -> vector<8x256xf32>
    %53 = vector.broadcast %4 : vector<1x256xf32> to vector<8x256xf32>
    %54 = arith.mulf %53, %52 : vector<8x256xf32>
    %c240_i32_24 = arith.constant 240 : i32
    %55 = tpu.dynamic_rotate %51 by %c240_i32_24 dim 1 : vector<8x256xf32>, i32 -> vector<8x256xf32>
    %56 = vector.broadcast %5 : vector<1x256xf32> to vector<8x256xf32>
    %57 = arith.mulf %56, %55 : vector<8x256xf32>
    %c0_25 = arith.constant 0 : index
    %c0_26 = arith.constant 0 : index
    %c0_27 = arith.constant 0 : index
    %58 = vector.load %arg7[%c0_25, %c0_26, %c0_27] : memref<9x8x1xf32, #tpu.memory_space<vmem>>, vector<1x8x1xf32>
    %59 = vector.shape_cast %58 : vector<1x8x1xf32> to vector<8x1xf32>
    %c1_i32_28 = arith.constant 1 : i32
    %60 = tpu.dynamic_rotate %54 by %c1_i32_28 dim 1 : vector<8x256xf32>, i32 -> vector<8x256xf32>
    %61 = vector.broadcast %2 : vector<1x256xf32> to vector<8x256xf32>
    %62 = arith.mulf %61, %60 : vector<8x256xf32>
    %63 = vector.broadcast %59 : vector<8x1xf32> to vector<8x256xf32>
    %64 = arith.mulf %63, %62 : vector<8x256xf32>
    %c1_29 = arith.constant 1 : index
    %c0_30 = arith.constant 0 : index
    %c0_31 = arith.constant 0 : index
    %65 = vector.load %arg7[%c1_29, %c0_30, %c0_31] : memref<9x8x1xf32, #tpu.memory_space<vmem>>, vector<1x8x1xf32>
    %66 = vector.shape_cast %65 : vector<1x8x1xf32> to vector<8x1xf32>
    %67 = vector.broadcast %66 : vector<8x1xf32> to vector<8x256xf32>
    %68 = arith.mulf %67, %54 : vector<8x256xf32>
    %69 = arith.addf %64, %68 : vector<8x256xf32>
    %c2_32 = arith.constant 2 : index
    %c0_33 = arith.constant 0 : index
    %c0_34 = arith.constant 0 : index
    %70 = vector.load %arg7[%c2_32, %c0_33, %c0_34] : memref<9x8x1xf32, #tpu.memory_space<vmem>>, vector<1x8x1xf32>
    %71 = vector.shape_cast %70 : vector<1x8x1xf32> to vector<8x1xf32>
    %c255_i32_35 = arith.constant 255 : i32
    %72 = tpu.dynamic_rotate %54 by %c255_i32_35 dim 1 : vector<8x256xf32>, i32 -> vector<8x256xf32>
    %73 = vector.broadcast %3 : vector<1x256xf32> to vector<8x256xf32>
    %74 = arith.mulf %73, %72 : vector<8x256xf32>
    %75 = vector.broadcast %71 : vector<8x1xf32> to vector<8x256xf32>
    %76 = arith.mulf %75, %74 : vector<8x256xf32>
    %77 = arith.addf %69, %76 : vector<8x256xf32>
    %c3 = arith.constant 3 : index
    %c0_36 = arith.constant 0 : index
    %c0_37 = arith.constant 0 : index
    %78 = vector.load %arg7[%c3, %c0_36, %c0_37] : memref<9x8x1xf32, #tpu.memory_space<vmem>>, vector<1x8x1xf32>
    %79 = vector.shape_cast %78 : vector<1x8x1xf32> to vector<8x1xf32>
    %c1_i32_38 = arith.constant 1 : i32
    %80 = tpu.dynamic_rotate %51 by %c1_i32_38 dim 1 : vector<8x256xf32>, i32 -> vector<8x256xf32>
    %81 = vector.broadcast %2 : vector<1x256xf32> to vector<8x256xf32>
    %82 = arith.mulf %81, %80 : vector<8x256xf32>
    %83 = vector.broadcast %79 : vector<8x1xf32> to vector<8x256xf32>
    %84 = arith.mulf %83, %82 : vector<8x256xf32>
    %c4 = arith.constant 4 : index
    %c0_39 = arith.constant 0 : index
    %c0_40 = arith.constant 0 : index
    %85 = vector.load %arg7[%c4, %c0_39, %c0_40] : memref<9x8x1xf32, #tpu.memory_space<vmem>>, vector<1x8x1xf32>
    %86 = vector.shape_cast %85 : vector<1x8x1xf32> to vector<8x1xf32>
    %87 = vector.broadcast %86 : vector<8x1xf32> to vector<8x256xf32>
    %88 = arith.mulf %87, %51 : vector<8x256xf32>
    %89 = arith.addf %84, %88 : vector<8x256xf32>
    %c5 = arith.constant 5 : index
    %c0_41 = arith.constant 0 : index
    %c0_42 = arith.constant 0 : index
    %90 = vector.load %arg7[%c5, %c0_41, %c0_42] : memref<9x8x1xf32, #tpu.memory_space<vmem>>, vector<1x8x1xf32>
    %91 = vector.shape_cast %90 : vector<1x8x1xf32> to vector<8x1xf32>
    %c255_i32_43 = arith.constant 255 : i32
    %92 = tpu.dynamic_rotate %51 by %c255_i32_43 dim 1 : vector<8x256xf32>, i32 -> vector<8x256xf32>
    %93 = vector.broadcast %3 : vector<1x256xf32> to vector<8x256xf32>
    %94 = arith.mulf %93, %92 : vector<8x256xf32>
    %95 = vector.broadcast %91 : vector<8x1xf32> to vector<8x256xf32>
    %96 = arith.mulf %95, %94 : vector<8x256xf32>
    %97 = arith.addf %89, %96 : vector<8x256xf32>
    %98 = arith.addf %77, %97 : vector<8x256xf32>
    %c6 = arith.constant 6 : index
    %c0_44 = arith.constant 0 : index
    %c0_45 = arith.constant 0 : index
    %99 = vector.load %arg7[%c6, %c0_44, %c0_45] : memref<9x8x1xf32, #tpu.memory_space<vmem>>, vector<1x8x1xf32>
    %100 = vector.shape_cast %99 : vector<1x8x1xf32> to vector<8x1xf32>
    %c1_i32_46 = arith.constant 1 : i32
    %101 = tpu.dynamic_rotate %57 by %c1_i32_46 dim 1 : vector<8x256xf32>, i32 -> vector<8x256xf32>
    %102 = vector.broadcast %2 : vector<1x256xf32> to vector<8x256xf32>
    %103 = arith.mulf %102, %101 : vector<8x256xf32>
    %104 = vector.broadcast %100 : vector<8x1xf32> to vector<8x256xf32>
    %105 = arith.mulf %104, %103 : vector<8x256xf32>
    %c7 = arith.constant 7 : index
    %c0_47 = arith.constant 0 : index
    %c0_48 = arith.constant 0 : index
    %106 = vector.load %arg7[%c7, %c0_47, %c0_48] : memref<9x8x1xf32, #tpu.memory_space<vmem>>, vector<1x8x1xf32>
    %107 = vector.shape_cast %106 : vector<1x8x1xf32> to vector<8x1xf32>
    %108 = vector.broadcast %107 : vector<8x1xf32> to vector<8x256xf32>
    %109 = arith.mulf %108, %57 : vector<8x256xf32>
    %110 = arith.addf %105, %109 : vector<8x256xf32>
    %c8 = arith.constant 8 : index
    %c0_49 = arith.constant 0 : index
    %c0_50 = arith.constant 0 : index
    %111 = vector.load %arg7[%c8, %c0_49, %c0_50] : memref<9x8x1xf32, #tpu.memory_space<vmem>>, vector<1x8x1xf32>
    %112 = vector.shape_cast %111 : vector<1x8x1xf32> to vector<8x1xf32>
    %c255_i32_51 = arith.constant 255 : i32
    %113 = tpu.dynamic_rotate %57 by %c255_i32_51 dim 1 : vector<8x256xf32>, i32 -> vector<8x256xf32>
    %114 = vector.broadcast %3 : vector<1x256xf32> to vector<8x256xf32>
    %115 = arith.mulf %114, %113 : vector<8x256xf32>
    %116 = vector.broadcast %112 : vector<8x1xf32> to vector<8x256xf32>
    %117 = arith.mulf %116, %115 : vector<8x256xf32>
    %118 = arith.addf %110, %117 : vector<8x256xf32>
    %119 = arith.addf %98, %118 : vector<8x256xf32>
    %120 = arith.addf %0, %119 : vector<8x256xf32>
    %c0_52 = arith.constant 0 : index
    %c0_53 = arith.constant 0 : index
    %121 = vector.load %arg8[%c0_52, %c0_53] : memref<8x1xf32, #tpu.memory_space<vmem>>, vector<8x1xf32>
    %122 = vector.broadcast %121 : vector<8x1xf32> to vector<8x256xf32>
    %123 = arith.addf %120, %122 : vector<8x256xf32>
    %cst = arith.constant dense<0.000000e+00> : vector<8xf32>
    %124 = vector.multi_reduction <add>, %0, %cst [1] : vector<8x256xf32> to vector<8xf32>
    %125 = vector.shape_cast %124 : vector<8xf32> to vector<8x1xf32>
    %126 = arith.mulf %0, %0 : vector<8x256xf32>
    %cst_54 = arith.constant dense<0.000000e+00> : vector<8xf32>
    %127 = vector.multi_reduction <add>, %126, %cst_54 [1] : vector<8x256xf32> to vector<8xf32>
    %128 = vector.shape_cast %127 : vector<8xf32> to vector<8x1xf32>
    %cst_55 = arith.constant 3.906250e-03 : f32
    %129 = vector.broadcast %cst_55 : f32 to vector<8x1xf32>
    %130 = arith.mulf %125, %129 : vector<8x1xf32>
    %cst_56 = arith.constant 2.560000e+02 : f32
    %131 = vector.broadcast %cst_56 : f32 to vector<8x1xf32>
    %132 = arith.mulf %131, %130 : vector<8x1xf32>
    %133 = arith.mulf %132, %130 : vector<8x1xf32>
    %134 = arith.subf %128, %133 : vector<8x1xf32>
    %cst_57 = arith.constant 0.00392156886 : f32
    %135 = vector.broadcast %cst_57 : f32 to vector<8x1xf32>
    %136 = arith.mulf %134, %135 : vector<8x1xf32>
    %cst_58 = arith.constant 9.99999974E-5 : f32
    %137 = vector.broadcast %cst_58 : f32 to vector<8x1xf32>
    %138 = arith.addf %136, %137 : vector<8x1xf32>
    %cst_59 = arith.constant 4.000000e+00 : f32
    %139 = vector.broadcast %cst_59 : f32 to vector<8x1xf32>
    %140 = arith.mulf %139, %138 : vector<8x1xf32>
    %141 = tpu.reciprocal %140 {approx = true} : vector<8x1xf32> -> vector<8x1xf32>
    %142 = vector.broadcast %130 : vector<8x1xf32> to vector<8x256xf32>
    %143 = arith.subf %0, %142 : vector<8x256xf32>
    %144 = arith.mulf %143, %143 : vector<8x256xf32>
    %145 = vector.broadcast %141 : vector<8x1xf32> to vector<8x256xf32>
    %146 = arith.mulf %144, %145 : vector<8x256xf32>
    %cst_60 = arith.constant 5.000000e-01 : f32
    %147 = vector.broadcast %cst_60 : f32 to vector<8x256xf32>
    %148 = arith.addf %146, %147 : vector<8x256xf32>
    %cst_61 = arith.constant 5.000000e-01 : f32
    %149 = vector.broadcast %cst_61 : f32 to vector<8x256xf32>
    %150 = arith.mulf %149, %148 : vector<8x256xf32>
    %151 = math.tanh %150 : vector<8x256xf32>
    %cst_62 = arith.constant 5.000000e-01 : f32
    %152 = vector.broadcast %cst_62 : f32 to vector<8x256xf32>
    %153 = arith.mulf %152, %151 : vector<8x256xf32>
    %cst_63 = arith.constant 5.000000e-01 : f32
    %154 = vector.broadcast %cst_63 : f32 to vector<8x256xf32>
    %155 = arith.addf %153, %154 : vector<8x256xf32>
    %c0_64 = arith.constant 0 : index
    %c0_65 = arith.constant 0 : index
    %156 = vector.load %arg9[%c0_64, %c0_65] : memref<4x4xf32, #tpu.memory_space<vmem>>, vector<4x4xf32>
    %c0_66 = arith.constant 0 : index
    %c0_67 = arith.constant 0 : index
    %157 = vector.load %arg10[%c0_66, %c0_67] : memref<4x1xf32, #tpu.memory_space<vmem>>, vector<4x1xf32>
    %158 = vector.extract_strided_slice %123 {offsets = [0, 0], sizes = [4, 256], strides = [1, 1]} : vector<8x256xf32> to vector<4x256xf32>
    %cst_68 = arith.constant dense<0.000000e+00> : vector<4x256xf32>
    %159 = tpu.matmul %156, %158, %cst_68 {dimension_numbers = #tpu.dot_dimension_numbers<[1], [0], [0], [1], [0, 0, 1, 1], [], []>} : vector<4x4xf32>, vector<4x256xf32>, vector<4x256xf32> -> vector<4x256xf32>
    %160 = vector.broadcast %157 : vector<4x1xf32> to vector<4x256xf32>
    %161 = arith.addf %159, %160 : vector<4x256xf32>
    %162 = vector.extract_strided_slice %123 {offsets = [4, 0], sizes = [4, 256], strides = [1, 1]} : vector<8x256xf32> to vector<4x256xf32>
    %cst_69 = arith.constant dense<0.000000e+00> : vector<4x256xf32>
    %163 = tpu.matmul %156, %162, %cst_69 {dimension_numbers = #tpu.dot_dimension_numbers<[1], [0], [0], [1], [0, 0, 1, 1], [], []>} : vector<4x4xf32>, vector<4x256xf32>, vector<4x256xf32> -> vector<4x256xf32>
    %164 = vector.broadcast %157 : vector<4x1xf32> to vector<4x256xf32>
    %165 = arith.addf %163, %164 : vector<4x256xf32>
    %166 = tpu.concatenate %161, %165 in 0 : vector<4x256xf32>, vector<4x256xf32> -> vector<8x256xf32>
    %167 = arith.mulf %166, %155 : vector<8x256xf32>
    %c0_70 = arith.constant 0 : index
    %c0_71 = arith.constant 0 : index
    %168 = vector.load %arg11[%c0_70, %c0_71] : memref<8x256xf32, #tpu.memory_space<vmem>>, vector<8x256xf32>
    tpu.vector_store %arg11[%c0_70, %c0_71], %167 {strides = array<i32>} : memref<8x256xf32, #tpu.memory_space<vmem>>, vector<8x256xf32>,
    return
  }
  func.func @transform_0(%arg0: i32) -> (i32, i32) {
    %c0_i32 = arith.constant 0 : i32
    %c0_i32_0 = arith.constant 0 : i32
    return %arg0, %c0_i32 : i32, i32
  }
  func.func @transform_1(%arg0: i32) -> (i32, i32) {
    %c0_i32 = arith.constant 0 : i32
    %c0_i32_0 = arith.constant 0 : i32
    %c0_i32_1 = arith.constant 0 : i32
    return %c0_i32, %c0_i32_0 : i32, i32
  }
  func.func @transform_2(%arg0: i32) -> (i32, i32, i32) {
    %c0_i32 = arith.constant 0 : i32
    %c0_i32_0 = arith.constant 0 : i32
    %c0_i32_1 = arith.constant 0 : i32
    %c0_i32_2 = arith.constant 0 : i32
    return %c0_i32, %c0_i32_0, %c0_i32_1 : i32, i32, i32
  }
  func.func @transform_3(%arg0: i32) -> (i32, i32) {
    %c0_i32 = arith.constant 0 : i32
    %c0_i32_0 = arith.constant 0 : i32
    %c0_i32_1 = arith.constant 0 : i32
    return %c0_i32, %c0_i32_0 : i32, i32
  }
  func.func @transform_4(%arg0: i32) -> (i32, i32, i32) {
    %c0_i32 = arith.constant 0 : i32
    %c0_i32_0 = arith.constant 0 : i32
    %c0_i32_1 = arith.constant 0 : i32
    %c0_i32_2 = arith.constant 0 : i32
    return %c0_i32, %c0_i32_0, %c0_i32_1 : i32, i32, i32
  }
  func.func @transform_5(%arg0: i32) -> (i32, i32) {
    %c0_i32 = arith.constant 0 : i32
    %c0_i32_0 = arith.constant 0 : i32
    %c0_i32_1 = arith.constant 0 : i32
    return %c0_i32, %c0_i32_0 : i32, i32
  }
  func.func @transform_6(%arg0: i32) -> (i32, i32, i32) {
    %c0_i32 = arith.constant 0 : i32
    %c0_i32_0 = arith.constant 0 : i32
    %c0_i32_1 = arith.constant 0 : i32
    %c0_i32_2 = arith.constant 0 : i32
    return %c0_i32, %c0_i32_0, %c0_i32_1 : i32, i32, i32
  }
  func.func @transform_7(%arg0: i32) -> (i32, i32) {
    %c0_i32 = arith.constant 0 : i32
    %c0_i32_0 = arith.constant 0 : i32
    %c0_i32_1 = arith.constant 0 : i32
    return %c0_i32, %c0_i32_0 : i32, i32
  }
  func.func @transform_8(%arg0: i32) -> (i32, i32) {
    %c0_i32 = arith.constant 0 : i32
    %c0_i32_0 = arith.constant 0 : i32
    %c0_i32_1 = arith.constant 0 : i32
    return %c0_i32, %c0_i32_0 : i32, i32
  }
  func.func @transform_9(%arg0: i32) -> (i32, i32) {
    %c0_i32 = arith.constant 0 : i32
    %c0_i32_0 = arith.constant 0 : i32
    %c0_i32_1 = arith.constant 0 : i32
    return %c0_i32, %c0_i32_0 : i32, i32
  }
  func.func @transform_10(%arg0: i32) -> (i32, i32) {
    %c0_i32 = arith.constant 0 : i32
    %c0_i32_0 = arith.constant 0 : i32
    return %arg0, %c0_i32 : i32, i32
  }
}

</mosaic_0001>

<bundles_post_ra>
// kernel: tpu_custom_call.1
= control target key start
LH: loop header
LB: loop body
LE: loop exit
PB: predicated region body
PF: predicated region fallthrough
CT: control target
= control target key end

     0   :  { %s573_s15 = smov 127   ;;  %s574_s16 = smov 1   ;;  %v575_v2 = vmov 0   ;;  %s882_s0 = inlined_call_operand.vmem [shape: f32[8,256], index: 0, kind: input, shape index: {}]   ;;  %s883_s1 = inlined_call_operand.vmem [shape: f32[4,256], index: 1, kind: input, shape index: {}]   ;;  %s884_s2 = inlined_call_operand.vmem [shape: f32[3,8,1], index: 2, kind: input, shape index: {}]   ;;  %s885_s3 = inlined_call_operand.vmem [shape: f32[8,1], index: 3, kind: input, shape index: {}]   ;;  %s886_s4 = inlined_call_operand.vmem [shape: f32[3,8,1], index: 4, kind: input, shape index: {}]   ;;  %s887_s5 = inlined_call_operand.vmem [shape: f32[8,1], index: 5, kind: input, shape index: {}]   ;;  %s888_s6 = inlined_call_operand.vmem [shape: f32[9,8,1], index: 6, kind: input, shape index: {}]   ;;  %s889_s7 = inlined_call_operand.vmem [shape: f32[8,1], index: 7, kind: input, shape index: {}]   ;;  %s890_s8 = inlined_call_operand.vmem [shape: f32[4,4], index: 8, kind: input, shape index: {}]   ;;  %s891_s9 = inlined_call_operand.vmem [shape: f32[4,1], index: 9, kind: input, shape index: {}]   ;;  %s892_s10 = inlined_call_operand.hbm [shape: f32[8,256], index: 10, kind: output, shape index: {}]  }
   0x1   :  { %v637_v0 = vld [vmem:[%s882_s0] sm:$0xff]  ;;  %539 = vset.pattern.permute.xlu0 %v575_v2  ;;  %540 = vset.pattern.permute.xlu1 %v575_v2 }
   0x2   :  { %78 = vrot.lane.b32.xlu1 %v637_v0, %s573_s15  ;;  %40 = vrot.lane.b32.xlu0 %v637_v0, %s574_s16  ;;  %v39_v1 = vld [vmem:[%s884_s2] sm:$0xff] }
   0x3   :  { %15 = vsyncpa [#allocation3], 0  ;;  %538 = vset.pattern.permute.xlu2 %v575_v2  ;;  %v649_v3 = vld [vmem:[%s882_s0 + $0x8] sm:$0xff]  ;;  %v513_v5 = vld [vmem:[%s884_s2 + $0x10] sm:$0xff]  ;;  %v44_v7 = vlaneseq  ;;  %vm391_vm4 = vcmask 1043456   ;;  %vm387_vm5 = vcmask 31744  }
   0x4   :  { %60 = vperm.xlu2 %538, %v39_v1   ;;  %v512_v4 = vld [vmem:[%s884_s2 + $0x8] sm:$0xff]  ;;  %v102_v6 = vld [vmem:[%s885_s3] sm:$0xff]  ;;  %s577_s2 = smov 16   ;;  %v515_v46 = vld [vmem:[%s886_s4 + $0x10] sm:$0xff]  ;;  %s503_s13 = sshll.u32 %s892_s10, 4  ;;  %s504_s13 = int_to_ptr.hbm [resolvable:$true] %s503_s13 }
   0x5   :  { %v667_v8 = vld [vmem:[%s883_s1] sm:$0xff]  ;;  %v669_v12 = vand.u32 127, %v44_v7  ;;  %s576_s1 = smov 112   ;;  %v518_v48 = vld [vmem:[%s888_s6 + $0x18] sm:$0xff]  ;;  %v514_v50 = vld [vmem:[%s886_s4 + $0x8] sm:$0xff] }
   0x6   :  { %v50_v13 = vperm.slane %v667_v8, 0  ;;  %v51_v14 = vperm.slane %v667_v8, 4  ;;  %v85_v17 = vperm.slane %v667_v8, 1  ;;  %v86_v18 = vperm.slane %v667_v8, 5  ;;  %v110_v47 = vld [vmem:[%s886_s4] sm:$0xff]  ;;  %v516_v52 = vld [vmem:[%s888_s6 + $0x8] sm:$0xff] }
   0x7   :  { %vm46_vm0 = vcmp.lt.s32.totalorder %v669_v12, 1  ;;  %vm82_vm1 = vcmp.lt.s32.totalorder %v669_v12, 127  ;;  %v170_v49 = vld [vmem:[%s887_s5] sm:$0xff]  ;;  %v118_v55 = vperm.slane %v667_v8, 2  ;;  %v119_v56 = vperm.slane %v667_v8, 6 }
   0x8   :  { %v674_v15 = vperm.slane %v50_v13, 0  ;;  %v676_v16 = vperm.slane %v51_v14, 0  ;;  %v687_v25 = vperm.slane %v85_v17, 1  ;;  %v689_v26 = vperm.slane %v86_v18, 1  ;;  %v194_v51 = vld [vmem:[%s888_s6] sm:$0xff] }
   0x9   :  { %vm115_vm2 = vcmp.lt.s32.totalorder %v669_v12, 16  ;;  %v153_v59 = vperm.slane %v667_v8, 3  ;;  %v154_v60 = vperm.slane %v667_v8, 7  ;;  %v122_v61 = vperm.slane %v118_v55, 2  ;;  %v340_v55 = vld [vmem:[%s889_s7] sm:$0xff] }
   0xa   :  { %80 = vrot.lane.b32.xlu1 %v649_v3, %s573_s15  ;;  %42 = vrot.lane.b32.xlu0 %v649_v3, %s574_s16  ;;  %v123_v62 = vperm.slane %v119_v56, 2  ;;  %vm150_vm3 = vcmp.lt.s32.totalorder %v669_v12, 112  ;;  %v381_v56 = vld [vmem:[%s891_s9] sm:$0xf] }
   0xc   :  { %69 = vperm.xlu2 %538, %v512_v4   ;;  %v157_v4 = vperm.slane %v153_v59, 3 }
  0x12   :  { %95 = vperm.xlu0 %539, %v513_v5   ;;  %105 = vperm.xlu1 %540, %v102_v6   ;;  %v158_v5 = vperm.slane %v154_v60, 3  ;;  %v351_v60 = vmul.f32 %v637_v0, %v637_v0 }
  0x5e   :  { %v61_v11 = vpop.permute.xlu2 %60 }
  0x66   :  { %v70_v27 = vpop.permute.xlu2 %69 }
  0x67   :  { %v72_v32 = vmul.f32 %v70_v27, %v637_v0  ;;  %v73_v33 = vmul.f32 %v70_v27, %v649_v3 }
  0x74   :  { %v79_v9 = vpop.permute.xlu1 %78  ;;  %v41_v10 = vpop.permute.xlu0 %40 }
  0x7c   :  { %v43_v19 = vpop.permute.xlu0 %42  ;;  %v81_v20 = vpop.permute.xlu1 %80 }
  0x7d   :  { %v47_v21 = vsel %vm46_vm0, %v41_v10, %v43_v19  ;;  %v48_v22 = vsel %vm46_vm0, %v43_v19, %v41_v10  ;;  %v83_v28 = vsel %vm82_vm1, %v79_v9, %v81_v20  ;;  %v84_v29 = vsel %vm82_vm1, %v81_v20, %v79_v9 }
  0x7e   :  { %v56_v23 = vmul.f32 %v674_v15, %v48_v22  ;;  %v57_v24 = vmul.f32 %v676_v16, %v47_v21  ;;  %v91_v34 = vmul.f32 %v687_v25, %v83_v28  ;;  %v92_v35 = vmul.f32 %v689_v26, %v84_v29 }
  0x80   :  { %v63_v30 = vmul.f32 %v61_v11, %v56_v23  ;;  %v64_v31 = vmul.f32 %v61_v11, %v57_v24 }
  0x82   :  { %v74_v39 = vadd.f32 %v72_v32, %v63_v30  ;;  %v75_v40 = vadd.f32 %v73_v33, %v64_v31  ;;  %v519_v32 = vld [vmem:[%s888_s6 + $0x20] sm:$0xff]  ;;  %v517_v33 = vld [vmem:[%s888_s6 + $0x10] sm:$0xff] }
  0x84   :  { %v96_v36 = vpop.permute.xlu0 %95  ;;  %v106_v41 = vpop.permute.xlu1 %105 }
  0x85   :  { %v98_v37 = vmul.f32 %v96_v36, %v91_v34  ;;  %v99_v38 = vmul.f32 %v96_v36, %v92_v35  ;;  %v520_v34 = vld [vmem:[%s888_s6 + $0x28] sm:$0xff] }
  0x87   :  { %v100_v42 = vadd.f32 %v98_v37, %v74_v39  ;;  %v101_v43 = vadd.f32 %v99_v38, %v75_v40 }
  0x89   :  { %v108_v44 = vadd.f32 %v106_v41, %v100_v42  ;;  %v109_v45 = vadd.f32 %v106_v41, %v101_v43 }
  0x8b   :  { %148 = vrot.lane.b32.xlu0 %v109_v45, %s576_s1  ;;  %113 = vrot.lane.b32.xlu1 %v109_v45, %s577_s2 }
  0x8c   :  { %111 = vrot.lane.b32.xlu2 %v108_v44, %s577_s2 }
  0x93   :  { %163 = vperm.xlu0 %539, %v515_v46   ;;  %128 = vperm.xlu1 %540, %v110_v47  }
  0x94   :  { %146 = vrot.lane.b32.xlu2 %v108_v44, %s576_s1 }
  0x9b   :  { %252 = vperm.xlu0 %539, %v518_v48   ;;  %173 = vperm.xlu1 %540, %v170_v49  }
  0x9c   :  { %137 = vperm.xlu2 %538, %v514_v50  }
  0xa3   :  { %205 = vperm.xlu1 %540, %v194_v51  }
  0xa4   :  { %214 = vperm.xlu2 %538, %v516_v52   ;;  %v522_v52 = vld [vmem:[%s888_s6 + $0x38] sm:$0xff] }
  0xe6   :  { %v112_v53 = vpop.permute.xlu2 %111 }
  0xee   :  { %v147_v54 = vpop.permute.xlu2 %146 }
  0xf6   :  { %v138_v2 = vpop.permute.xlu2 %137 }
  0xf7   :  { %v140_v11 = vmul.f32 %v138_v2, %v108_v44  ;;  %v141_v13 = vmul.f32 %v138_v2, %v109_v45 }
  0xfd   :  { %v149_v57 = vpop.permute.xlu0 %148  ;;  %v114_v58 = vpop.permute.xlu1 %113 }
  0xfe   :  { %v116_v63 = vsel %vm115_vm2, %v112_v53, %v114_v58  ;;  %v117_v1 = vsel %vm115_vm2, %v114_v58, %v112_v53  ;;  %v151_v9 = vsel %vm150_vm3, %v147_v54, %v149_v57  ;;  %v152_v8 = vsel %vm150_vm3, %v149_v57, %v147_v54  ;;  %v215_v35 = vpop.permute.xlu2 %214  ;;  %v521_v53 = vld [vmem:[%s888_s6 + $0x30] sm:$0xff]  ;;  %v523_v54 = vld [vmem:[%s888_s6 + $0x40] sm:$0xff] }
  0xff   :  { %v124_v6 = vmul.f32 %v122_v61, %v117_v1  ;;  %v125_v7 = vmul.f32 %v123_v62, %v116_v63  ;;  %v159_v19 = vmul.f32 %v157_v4, %v151_v9  ;;  %v160_v20 = vmul.f32 %v158_v5, %v152_v8 }
 0x100   :  { %v348_v58 = vadd.f32 %v649_v3, %v637_v0 }
 0x105   :  { %v129_v10 = vpop.permute.xlu1 %128  ;;  %v164_v18 = vpop.permute.xlu0 %163 }
 0x106   :  { %v131_v14 = vmul.f32 %v129_v10, %v124_v6  ;;  %v132_v17 = vmul.f32 %v129_v10, %v125_v7  ;;  %v166_v23 = vmul.f32 %v164_v18, %v159_v19  ;;  %v167_v24 = vmul.f32 %v164_v18, %v160_v20 }
 0x108   :  { %v142_v21 = vadd.f32 %v140_v11, %v131_v14  ;;  %v143_v22 = vadd.f32 %v141_v13, %v132_v17 }
 0x10a   :  { %v168_v27 = vadd.f32 %v166_v23, %v142_v21  ;;  %v169_v28 = vadd.f32 %v167_v24, %v143_v22 }
 0x10d   :  { %v174_v29 = vpop.permute.xlu1 %173  ;;  %v767_v36 = vpop.permute.xlu0 %252 }
 0x10e   :  { %v738_v30 = vadd.f32 %v174_v29, %v168_v27  ;;  %v740_v31 = vadd.f32 %v174_v29, %v169_v28 }
 0x110   :  { %180 = vrot.lane.b32.xlu0 %v740_v31, %s577_s2  ;;  %186 = vrot.lane.b32.xlu1 %v738_v30, %s576_s1 }
 0x111   :  { %178 = vrot.lane.b32.xlu2 %v738_v30, %s577_s2 }
 0x115   :  { %v769_v37 = vpop.permute.xlu1 %205 }
 0x118   :  { %244 = vrot.lane.b32.xlu0 %v740_v31, %s574_s16  ;;  %261 = vperm.xlu1 %540, %v519_v32  }
 0x119   :  { %188 = vrot.lane.b32.xlu2 %v740_v31, %s576_s1 }
 0x120   :  { %270 = vrot.lane.b32.xlu0 %v738_v30, %s573_s15  ;;  %233 = vperm.xlu1 %540, %v517_v33  }
 0x121   :  { %280 = vperm.xlu2 %538, %v520_v34  }
 0x128   :  { %272 = vrot.lane.b32.xlu1 %v740_v31, %s573_s15 }
 0x129   :  { %242 = vrot.lane.b32.xlu2 %v738_v30, %s574_s16 }
 0x16b   :  { %v179_v38 = vpop.permute.xlu2 %178 }
 0x173   :  { %v189_v47 = vpop.permute.xlu2 %188 }
 0x17b   :  { %v281_v59 = vpop.permute.xlu2 %280 }
 0x182   :  { %v181_v39 = vpop.permute.xlu0 %180  ;;  %v187_v46 = vpop.permute.xlu1 %186 }
 0x183   :  { %v182_v40 = vsel %vm115_vm2, %v179_v38, %v181_v39  ;;  %v183_v41 = vsel %vm115_vm2, %v181_v39, %v179_v38  ;;  %v190_v48 = vsel %vm150_vm3, %v187_v46, %v189_v47  ;;  %v191_v49 = vsel %vm150_vm3, %v189_v47, %v187_v46  ;;  %v243_v2 = vpop.permute.xlu2 %242 }
 0x184   :  { %v184_v42 = vmul.f32 %v183_v41, %v122_v61  ;;  %v185_v43 = vmul.f32 %v182_v40, %v123_v62  ;;  %v786_v50 = vmul.f32 %v190_v48, %v157_v4  ;;  %v788_v51 = vmul.f32 %v191_v49, %v158_v5 }
 0x185   :  { %v352_v61 = vmul.f32 %v649_v3, %v649_v3 }
 0x186   :  { %v775_v44 = vmul.f32 %v215_v35, %v184_v42  ;;  %v777_v45 = vmul.f32 %v215_v35, %v185_v43  ;;  %195 = vrot.lane.b32.xlu0 %v184_v42, %s574_s16  ;;  %225 = vrot.lane.b32.xlu2 %v185_v43, %s573_s15 }
 0x187   :  { %197 = vrot.lane.b32.xlu1 %v185_v43, %s574_s16  ;;  %v353_v62 = vadd.f32 %v352_v61, %v351_v60 }
 0x18a   :  { %v262_v57 = vpop.permute.xlu1 %261  ;;  %v245_v63 = vpop.permute.xlu0 %244 }
 0x18b   :  { %v246_v9 = vsel %vm46_vm0, %v243_v2, %v245_v63  ;;  %v247_v8 = vsel %vm46_vm0, %v245_v63, %v243_v2  ;;  %v264_v35 = vmul.f32 %v262_v57, %v738_v30  ;;  %v265_v38 = vmul.f32 %v262_v57, %v740_v31 }
 0x18c   :  { %v248_v14 = vmul.f32 %v247_v8, %v674_v15  ;;  %v249_v17 = vmul.f32 %v246_v9, %v676_v16 }
 0x18e   :  { %293 = vrot.lane.b32.xlu0 %v788_v51, %s574_s16  ;;  %291 = vrot.lane.b32.xlu2 %v786_v50, %s574_s16  ;;  %v255_v27 = vmul.f32 %v767_v36, %v248_v14  ;;  %v256_v28 = vmul.f32 %v767_v36, %v249_v17 }
 0x18f   :  { %223 = vrot.lane.b32.xlu1 %v184_v42, %s573_s15 }
 0x190   :  { %v266_v46 = vadd.f32 %v264_v35, %v255_v27  ;;  %v267_v47 = vadd.f32 %v265_v38, %v256_v28 }
 0x192   :  { %v234_v1 = vpop.permute.xlu1 %233  ;;  %v271_v4 = vpop.permute.xlu0 %270 }
 0x196   :  { %321 = vrot.lane.b32.xlu0 %v788_v51, %s573_s15  ;;  %319 = vrot.lane.b32.xlu2 %v786_v50, %s573_s15 }
 0x197   :  { %310 = vperm.xlu1 %540, %v522_v52  }
 0x19a   :  { %v273_v5 = vpop.permute.xlu1 %272 }
 0x19b   :  { %v274_v18 = vsel %vm82_vm1, %v271_v4, %v273_v5  ;;  %v275_v19 = vsel %vm82_vm1, %v273_v5, %v271_v4 }
 0x19c   :  { %v276_v23 = vmul.f32 %v274_v18, %v687_v25  ;;  %v277_v24 = vmul.f32 %v275_v19, %v689_v26 }
 0x19e   :  { %301 = vperm.xlu0 %539, %v521_v53   ;;  %329 = vperm.xlu2 %538, %v523_v54   ;;  %v283_v41 = vmul.f32 %v281_v59, %v276_v23  ;;  %v284_v42 = vmul.f32 %v281_v59, %v277_v24 }
 0x1a0   :  { %v285_v49 = vadd.f32 %v283_v41, %v266_v46  ;;  %v286_v52 = vadd.f32 %v284_v42, %v267_v47 }
 0x1a6   :  { %343 = vperm.xlu0 %539, %v340_v55  }
 0x1ae   :  { %384 = vperm.xlu0 %539, %v381_v56  }
 0x1c1   :  { %349 = vadd.xlane.f32.xlu1 %v348_v58 }
 0x1c7   :  { %354 = vadd.xlane.f32.xlu2 %v353_v62 }
 0x1e0   :  { %v226_v6 = vpop.permute.xlu2 %225 }
 0x1e8   :  { %v292_v22 = vpop.permute.xlu2 %291 }
 0x1f0   :  { %v320_v55 = vpop.permute.xlu2 %319 }
 0x1f8   :  { %v196_v7 = vpop.permute.xlu0 %195  ;;  %v330_v8 = vpop.permute.xlu2 %329 }
 0x1f9   :  { %v198_v10 = vpop.permute.xlu1 %197 }
 0x1fa   :  { %v199_v11 = vsel %vm46_vm0, %v196_v7, %v198_v10  ;;  %v200_v13 = vsel %vm46_vm0, %v198_v10, %v196_v7 }
 0x1fb   :  { %v201_v20 = vmul.f32 %v200_v13, %v674_v15  ;;  %v202_v21 = vmul.f32 %v199_v11, %v676_v16 }
 0x1fd   :  { %v208_v32 = vmul.f32 %v769_v37, %v201_v20  ;;  %v209_v33 = vmul.f32 %v769_v37, %v202_v21 }
 0x1ff   :  { %v219_v37 = vadd.f32 %v775_v44, %v208_v32  ;;  %v220_v30 = vadd.f32 %v777_v45, %v209_v33 }
 0x200   :  { %v294_v29 = vpop.permute.xlu0 %293 }
 0x201   :  { %v224_v34 = vpop.permute.xlu1 %223  ;;  %v295_v59 = vsel %vm46_vm0, %v292_v22, %v294_v29  ;;  %v296_v60 = vsel %vm46_vm0, %v294_v29, %v292_v22 }
 0x202   :  { %v227_v39 = vsel %vm82_vm1, %v224_v34, %v226_v6  ;;  %v228_v40 = vsel %vm82_vm1, %v226_v6, %v224_v34  ;;  %v297_v62 = vmul.f32 %v296_v60, %v674_v15  ;;  %v298_v63 = vmul.f32 %v295_v59, %v676_v16 }
 0x203   :  { %v229_v36 = vmul.f32 %v227_v39, %v687_v25  ;;  %v230_v43 = vmul.f32 %v228_v40, %v689_v26 }
 0x205   :  { %v236_v48 = vmul.f32 %v234_v1, %v229_v36  ;;  %v237_v31 = vmul.f32 %v234_v1, %v230_v43 }
 0x207   :  { %v238_v53 = vadd.f32 %v236_v48, %v219_v37  ;;  %v239_v54 = vadd.f32 %v237_v31, %v220_v30 }
 0x208   :  { %v322_v56 = vpop.permute.xlu0 %321 }
 0x209   :  { %v287_v57 = vadd.f32 %v285_v49, %v238_v53  ;;  %v288_v58 = vadd.f32 %v286_v52, %v239_v54  ;;  %v323_v44 = vsel %vm82_vm1, %v320_v55, %v322_v56  ;;  %v324_v45 = vsel %vm82_vm1, %v322_v56, %v320_v55  ;;  %v311_v61 = vpop.permute.xlu1 %310 }
 0x20a   :  { %v325_v1 = vmul.f32 %v323_v44, %v687_v25  ;;  %v326_v2 = vmul.f32 %v324_v45, %v689_v26  ;;  %v313_v5 = vmul.f32 %v311_v61, %v786_v50  ;;  %v314_v6 = vmul.f32 %v311_v61, %v788_v51  ;;  %v380_v51 = vld [vmem:[%s890_s8] sm:$0xf]  ;;  %s578_s8 = smov [#allocation2]  }
 0x20b   :  { %s501_s9 = sshll.u32 %s578_s8, 4  ;;  %s502_s9 = int_to_ptr.vmem [resolvable:$true] %s501_s9 }
 0x20c   :  { %v332_v10 = vmul.f32 %v330_v8, %v325_v1  ;;  %v333_v12 = vmul.f32 %v330_v8, %v326_v2 }
 0x210   :  { %v302_v4 = vpop.permute.xlu0 %301 }
 0x211   :  { %v304_v7 = vmul.f32 %v302_v4, %v297_v62  ;;  %v305_v9 = vmul.f32 %v302_v4, %v298_v63 }
 0x213   :  { %v315_v11 = vadd.f32 %v313_v5, %v304_v7  ;;  %v316_v13 = vadd.f32 %v314_v6, %v305_v9 }
 0x215   :  { %v334_v14 = vadd.f32 %v332_v10, %v315_v11  ;;  %v335_v15 = vadd.f32 %v333_v12, %v316_v13 }
 0x217   :  { %v336_v17 = vadd.f32 %v334_v14, %v287_v57  ;;  %v337_v16 = vadd.f32 %v335_v15, %v288_v58 }
 0x218   :  { %v344_v18 = vpop.permute.xlu0 %343 }
 0x219   :  { %v338_v25 = vadd.f32 %v336_v17, %v637_v0  ;;  %v339_v26 = vadd.f32 %v337_v16, %v649_v3 }
 0x21b   :  { %v346_v50 = vadd.f32 %v344_v18, %v338_v25  ;;  %v347_v19 = vadd.f32 %v344_v18, %v339_v26 }
 0x21d   :  { %524 = vmatpush.msk.msra.mxu0 %vm391_vm4, %v346_v50  ;;  %526 = vmatpush.msk.msra.mxu1 %vm391_vm4, %v347_v19  ;;  %v438_v20 = vrot.slane %v346_v50, 4  ;;  %v439_v21 = vrot.slane %v347_v19, 4 }
 0x21e   :  { %525 = vmatmul.msk.f32.vlgmr.msra.gmra.mxu0 %vm387_vm5, %v380_v51  ;;  %527 = vmatmul.msk.f32.vlgmr.msra.gmra.mxu1 %vm387_vm5, %v380_v51 }
 0x21f   :  { %528 = vmatpush.msk.msra.mxu2 %vm391_vm4, %v438_v20  ;;  %530 = vmatpush.msk.msra.mxu3 %vm391_vm4, %v439_v21 }
 0x220   :  { %529 = vmatmul.msk.f32.vlgmr.msra.gmra.mxu2 %vm387_vm5, %v380_v51  ;;  %531 = vmatmul.msk.f32.vlgmr.msra.gmra.mxu3 %vm387_vm5, %v380_v51  ;;  %v385_v31 = vpop.permute.xlu0 %384 }
 0x234   :  { %v350_v22 = vpop.xlane.xlu1 %349 }
 0x235   :  { %v356_v23 = vmul.f32 0.00390625, %v350_v22 }
 0x237   :  { %v357_v24 = vmul.f32 256.0, %v356_v23  ;;  %v364_v35 = vsub.f32 %v637_v0, %v356_v23  ;;  %v365_v38 = vsub.f32 %v649_v3, %v356_v23 }
 0x239   :  { %v358_v27 = vmul.f32 %v357_v24, %v356_v23  ;;  %v366_v39 = vmul.f32 %v364_v35, %v364_v35  ;;  %v367_v41 = vmul.f32 %v365_v38, %v365_v38 }
 0x23a   :  { %v355_v28 = vpop.xlane.xlu2 %354 }
 0x23b   :  { %v359_v29 = vsub.f32 %v355_v28, %v358_v27 }
 0x23d   :  { %v360_v32 = vmul.f32 0.003921569, %v359_v29 }
 0x23f   :  { %v361_v33 = vadd.f32 0.0001, %v360_v32 }
 0x241   :  { %v362_v34 = vmul.f32 4.0, %v361_v33 }
 0x243   :  { %541 = vrcp.f32 %v362_v34 }
 0x249   :  { %v542_v40 = vpop.eup %541 }
 0x24a   :  { %v368_v42 = vmul.f32 %v542_v40, %v366_v39  ;;  %v369_v36 = vmul.f32 %v542_v40, %v367_v41 }
 0x24c   :  { %v370_v43 = vadd.f32 0.5, %v368_v42  ;;  %v371_v46 = vadd.f32 0.5, %v369_v36 }
 0x24e   :  { %v372_v47 = vmul.f32 0.5, %v370_v43  ;;  %v373_v37 = vmul.f32 0.5, %v371_v46 }
 0x250   :  { %543 = vtanh.f32 %v372_v47 }
 0x251   :  { %545 = vtanh.f32 %v373_v37 }
 0x256   :  { %v544_v30 = vpop.eup %543 }
 0x257   :  { %v546_v48 = vpop.eup %545  ;;  %v376_v54 = vmul.f32 0.5, %v544_v30 }
 0x258   :  { %v377_v3 = vmul.f32 0.5, %v546_v48 }
 0x259   :  { %v378_v44 = vadd.f32 0.5, %v376_v54 }
 0x25a   :  { %v379_v45 = vadd.f32 0.5, %v377_v3 }
 0x29b   :  { %v415_v49 = vpop.f32.mrf.mxu0  ;;  %v435_v52 = vpop.f32.mrf.mxu1 }
 0x29c   :  { %v416_v57 = vadd.f32 %v415_v49, %v385_v31  ;;  %v436_v58 = vadd.f32 %v435_v52, %v385_v31 }
 0x2a3   :  { %v461_v53 = vpop.f32.mrf.mxu2  ;;  %v481_v0 = vpop.f32.mrf.mxu3 }
 0x2a4   :  { %v462_v55 = vadd.f32 %v461_v53, %v385_v31  ;;  %v482_v56 = vadd.f32 %v481_v0, %v385_v31 }
 0x2a6   :  { %v486_v59 = vrot.slane %v462_v55, 4  ;;  %v487_v60 = vrot.slane %v482_v56, 4 }
 0x2a8   :  { %v490_v61 = vsel %vm391_vm4, %v416_v57, %v486_v59  ;;  %v491_v62 = vsel %vm391_vm4, %v436_v58, %v487_v60 }
 0x2a9   :  { %v492_v63 = vmul.f32 %v490_v61, %v378_v44  ;;  %v493_v1 = vmul.f32 %v491_v62, %v379_v45 }
 0x2ab   :  { %494 = vst [vmem:[#allocation2] sm:$0xff] %v492_v63 }
 0x2ac   :  { %495 = vst [vmem:[#allocation2 + $0x8] sm:$0xff] %v493_v1 }
 0x2ad   :  { %506 = dma.vmem_to_hbm [thread:$0]  %s502_s9, 256, %s504_s13, [#allocation3]  }
 0x2ae   :  { %571 = dma.done.wait [#allocation3], 256  }
 0x2af   :  { %572 = vsyncadd [#allocation3], 4294967040 }
 0x2b0   :  { %511 = vsyncpa [#allocation3], 1 }

</bundles_post_ra>
